<compile_context>
chip_gen: v7x
topology: tpu7x:2x2x1
jax: 0.10.0
libtpu: 0.0.40
codegen_flags: <defaults>
</compile_context>

<pallas_src>
import functools

import jax
import jax.numpy as jnp
from jax.experimental import pallas as pl
from jax.experimental.pallas import tpu as pltpu


def _round_up(x, m):
    return ((x + m - 1) // m) * m


# ----------------------------------------------------------------------------
# Pallas kernel: one row-tile of the fused scorer + softmax + weighted combine.
# ----------------------------------------------------------------------------
def _mlp_self_attention_kernel(x_ref, mask_ref, w_ref, b_ref, g_ref, s_ref,
                               ctx_ref, scores_ref):
    # x_ref      : [TM, D]       flattened features, D = d_feat * domains
    # mask_ref   : [TM, 1]       int32 (0 => masked position)
    # w_ref      : [D, d_out]    scorer weight (transposed)
    # b_ref      : [1, d_out]    scorer bias
    # g_ref      : [d_out, D]    expand matrix: g[d, f*domains + d] = 1
    # s_ref      : [D, d_feat]   reduce matrix: s[f*domains + d, f] = 1
    # ctx_ref    : [TM, d_feat]
    # scores_ref : [TM, d_out]   masked pre-softmax logits
    x = x_ref[...]

    # scorer: Linear(d_hid -> d_out)  (MXU)
    logits = jnp.dot(x, w_ref[...], preferred_element_type=jnp.float32)
    logits = logits + b_ref[...]

    # masked_fill(mask == 0, -1e9)
    valid = mask_ref[...] != 0                       # [TM, 1] bool, broadcasts
    logits = jnp.where(valid, logits, -1000000000.0)
    scores_ref[...] = logits

    # softmax over d_out (numerically stable)
    m = jnp.max(logits, axis=-1, keepdims=True)
    e = jnp.exp(logits - m)
    p = e / jnp.sum(e, axis=-1, keepdims=True)       # [TM, d_out]

    # context[m, f] = sum_d p[m, d] * x[m, f*domains + d]
    #   p_exp[m, f*domains + d] = p[m, d]      (MXU, lane-dense)
    p_exp = jnp.dot(p, g_ref[...], preferred_element_type=jnp.float32)   # [TM, D]
    ctx_ref[...] = jnp.dot(x * p_exp, s_ref[...],
                           preferred_element_type=jnp.float32)           # [TM, d_feat]


# ----------------------------------------------------------------------------
# Wrapper: layout prep + pallas_call with a row-tiled grid.
# ----------------------------------------------------------------------------
def mlp_self_attention(inp, mask, w, b, *, block_m=128):
    """inp: [B, S, d_feat, domains], mask: [B, S], w: [d_out, d_hid], b: [d_out].
    Returns (context [B, S, d_feat], scores_ [B, S, d_out])."""
    B, S, F_, Dm = inp.shape
    Dh = F_ * Dm
    d_out = w.shape[0]
    assert d_out == Dm, "expand_as requires d_out == domains"
    M = B * S

    x2 = inp.reshape(M, Dh).astype(jnp.float32)
    mask2 = mask.reshape(M, 1).astype(jnp.int32)

    # Row tiling: TM rows per grid step (pad M so the grid divides evenly).
    TM = block_m if M >= block_m else _round_up(M, 8)
    Mp = _round_up(M, TM)
    if Mp != M:
        x2 = jnp.pad(x2, ((0, Mp - M), (0, 0)))
        mask2 = jnp.pad(mask2, ((0, Mp - M), (0, 0)))

    w_t = jnp.transpose(w).astype(jnp.float32)       # [Dh, d_out]
    b2 = b.reshape(1, d_out).astype(jnp.float32)

    # Constant selection matrices for the domain-weighted combine.
    lane = jnp.arange(Dh)
    feat_of_lane = lane // Dm                        # f for flattened index
    dom_of_lane = lane % Dm                          # d for flattened index
    expand_dom = (jnp.arange(Dm)[:, None] == dom_of_lane[None, :]
                  ).astype(jnp.float32)              # [Dm, Dh]
    sel_feat = (feat_of_lane[:, None] == jnp.arange(F_)[None, :]
                ).astype(jnp.float32)                # [Dh, F_]

    grid = (Mp // TM,)
    ctx, scores = pl.pallas_call(
        _mlp_self_attention_kernel,
        out_shape=(jax.ShapeDtypeStruct((Mp, F_), jnp.float32),
                   jax.ShapeDtypeStruct((Mp, d_out), jnp.float32)),
        grid=grid,
        in_specs=[
            pl.BlockSpec((TM, Dh), lambda i: (i, 0)),      # x (streamed)
            pl.BlockSpec((TM, 1), lambda i: (i, 0)),       # mask (streamed)
            pl.BlockSpec((Dh, d_out), lambda i: (0, 0)),   # W^T (resident)
            pl.BlockSpec((1, d_out), lambda i: (0, 0)),    # bias (resident)
            pl.BlockSpec((Dm, Dh), lambda i: (0, 0)),      # expand matrix
            pl.BlockSpec((Dh, F_), lambda i: (0, 0)),      # reduce matrix
        ],
        out_specs=(pl.BlockSpec((TM, F_), lambda i: (i, 0)),
                   pl.BlockSpec((TM, d_out), lambda i: (i, 0))),
        compiler_params=pltpu.CompilerParams(
            dimension_semantics=("parallel",)),
    )(x2, mask2, w_t, b2, expand_dom, sel_feat)

    context = ctx[:M].reshape(B, S, F_)
    scores_ = scores[:M].reshape(B, S, d_out)
    return context, scores_


# ----------------------------------------------------------------------------
# Plain-JAX reference (mirrors the PyTorch forward) for verification.
# ----------------------------------------------------------------------------
def mlp_self_attention_reference(inp, mask, w, b):
    B, S, F_, Dm = inp.shape
    x2 = inp.reshape(B, S, F_ * Dm)
    logits = jnp.einsum('bsd,od->bso', x2, w) + b
    logits = jnp.where((mask == 0)[..., None], -1000000000.0, logits)
    p = jax.nn.softmax(logits, axis=-1)
    context = jnp.sum(p[:, :, None, :] * inp, axis=-1)
    return context, logits


if __name__ == "__main__":
    B, S, d_feat, domains = 2, 8, 16, 4
    d_hid = d_feat * domains          # 64
    d_out = domains                   # expand_as requires d_out == domains

    key = jax.random.PRNGKey(0)
    k_w, k_b, k_x = jax.random.split(key, 3)
    bound = 1.0 / (d_hid ** 0.5)      # PyTorch nn.Linear init range
    w = jax.random.uniform(k_w, (d_out, d_hid), jnp.float32, -bound, bound)
    b = jax.random.uniform(k_b, (d_out,), jnp.float32, -bound, bound)
    inp = jax.random.normal(k_x, (B, S, d_feat, domains), jnp.float32)
    mask = jnp.ones((B, S), jnp.int32).at[1, 6:].set(0)   # 2nd seq: length 6

    fwd = jax.jit(functools.partial(mlp_self_attention, block_m=128))
    context, scores_ = fwd(inp, mask, w, b)
    jax.block_until_ready((context, scores_))

    assert context.shape == (B, S, d_feat)
    assert scores_.shape == (B, S, d_out)

    ctx_ref, scores_ref = mlp_self_attention_reference(inp, mask, w, b)
    assert bool(jnp.allclose(scores_, scores_ref, atol=1e-4, rtol=1e-4))
    assert bool(jnp.allclose(context, ctx_ref, atol=1e-4, rtol=1e-4))
    # masked positions must carry the -1e9 fill value
    assert bool(jnp.all(scores_[1, 6:, :] == -1000000000.0))

    print("KERNEL_OK")
</pallas_src>

<mosaic_0001>
module attributes {stable_mosaic.version = 11 : i64} {
  func.func @_mlp_self_attention_kernel(%arg0: i32, %arg1: memref<16x64xf32, #tpu.memory_space<vmem>>, %arg2: memref<16x1xi32, #tpu.memory_space<vmem>>, %arg3: memref<64x4xf32, #tpu.memory_space<vmem>>, %arg4: memref<1x4xf32, #tpu.memory_space<vmem>>, %arg5: memref<4x64xf32, #tpu.memory_space<vmem>>, %arg6: memref<64x16xf32, #tpu.memory_space<vmem>>, %arg7: memref<16x16xf32, #tpu.memory_space<vmem>>, %arg8: memref<16x4xf32, #tpu.memory_space<vmem>>) attributes {dimension_semantics = [#tpu.dimension_semantics<parallel>], iteration_bounds = array<i64: 1>, scalar_prefetch = 0 : i64, scratch_operands = 0 : i64, tpu.core_type = #tpu.core_type<tc>, window_params = [{transform_indices = @transform_0, window_bounds = array<i64: 16, 64>}, {transform_indices = @transform_1, window_bounds = array<i64: 16, 1>}, {pipeline_mode = #tpu.pipeline_mode<synchronous>, transform_indices = @transform_2, window_bounds = array<i64: 64, 4>}, {pipeline_mode = #tpu.pipeline_mode<synchronous>, transform_indices = @transform_3, window_bounds = array<i64: 1, 4>}, {pipeline_mode = #tpu.pipeline_mode<synchronous>, transform_indices = @transform_4, window_bounds = array<i64: 4, 64>}, {pipeline_mode = #tpu.pipeline_mode<synchronous>, transform_indices = @transform_5, window_bounds = array<i64: 64, 16>}, {transform_indices = @transform_6, window_bounds = array<i64: 16, 16>}, {transform_indices = @transform_7, window_bounds = array<i64: 16, 4>}]} {
    %c0 = arith.constant 0 : index
    %c0_0 = arith.constant 0 : index
    %0 = vector.load %arg1[%c0, %c0_0] : memref<16x64xf32, #tpu.memory_space<vmem>>, vector<16x64xf32>
    %c0_1 = arith.constant 0 : index
    %c0_2 = arith.constant 0 : index
    %1 = vector.load %arg3[%c0_1, %c0_2] : memref<64x4xf32, #tpu.memory_space<vmem>>, vector<64x4xf32>
    %cst = arith.constant dense<0.000000e+00> : vector<16x4xf32>
    %2 = tpu.matmul %0, %1, %cst {dimension_numbers = #tpu.dot_dimension_numbers<[1], [0], [0], [1], [0, 0, 1, 1], [], []>} : vector<16x64xf32>, vector<64x4xf32>, vector<16x4xf32> -> vector<16x4xf32>
    %c0_3 = arith.constant 0 : index
    %c0_4 = arith.constant 0 : index
    %3 = vector.load %arg4[%c0_3, %c0_4] : memref<1x4xf32, #tpu.memory_space<vmem>>, vector<1x4xf32>
    %4 = vector.broadcast %3 : vector<1x4xf32> to vector<16x4xf32>
    %5 = arith.addf %2, %4 : vector<16x4xf32>
    %c0_5 = arith.constant 0 : index
    %c0_6 = arith.constant 0 : index
    %6 = vector.load %arg2[%c0_5, %c0_6] : memref<16x1xi32, #tpu.memory_space<vmem>>, vector<16x1xi32>
    %c0_i32 = arith.constant 0 : i32
    %7 = vector.broadcast %c0_i32 : i32 to vector<16x1xi32>
    %8 = arith.cmpi ne, %6, %7 : vector<16x1xi32>
    %cst_7 = arith.constant -1.000000e+09 : f32
    %9 = vector.shape_cast %8 : vector<16x1xi1> to vector<16x1xi1>
    %10 = vector.broadcast %9 : vector<16x1xi1> to vector<16x4xi1>
    %11 = vector.broadcast %cst_7 : f32 to vector<16x4xf32>
    %12 = arith.select %10, %5, %11 : vector<16x4xi1>, vector<16x4xf32>
    %c0_8 = arith.constant 0 : index
    %c0_9 = arith.constant 0 : index
    %13 = vector.load %arg8[%c0_8, %c0_9] : memref<16x4xf32, #tpu.memory_space<vmem>>, vector<16x4xf32>
    tpu.vector_store %arg8[%c0_8, %c0_9], %12 {strides = array<i32>} : memref<16x4xf32, #tpu.memory_space<vmem>>, vector<16x4xf32>,
    %cst_10 = arith.constant dense<0xFF800000> : vector<16xf32>
    %14 = vector.multi_reduction <maximumf>, %12, %cst_10 [1] : vector<16x4xf32> to vector<16xf32>
    %15 = vector.shape_cast %14 : vector<16xf32> to vector<16x1xf32>
    %16 = vector.broadcast %15 : vector<16x1xf32> to vector<16x4xf32>
    %17 = arith.subf %12, %16 : vector<16x4xf32>
    %18 = math.exp %17 : vector<16x4xf32>
    %cst_11 = arith.constant dense<0.000000e+00> : vector<16xf32>
    %19 = vector.multi_reduction <add>, %18, %cst_11 [1] : vector<16x4xf32> to vector<16xf32>
    %20 = vector.shape_cast %19 : vector<16xf32> to vector<16x1xf32>
    %21 = vector.broadcast %20 : vector<16x1xf32> to vector<16x4xf32>
    %22 = arith.divf %18, %21 : vector<16x4xf32>
    %c0_12 = arith.constant 0 : index
    %c0_13 = arith.constant 0 : index
    %23 = vector.load %arg5[%c0_12, %c0_13] : memref<4x64xf32, #tpu.memory_space<vmem>>, vector<4x64xf32>
    %cst_14 = arith.constant dense<0.000000e+00> : vector<16x64xf32>
    %24 = tpu.matmul %22, %23, %cst_14 {dimension_numbers = #tpu.dot_dimension_numbers<[1], [0], [0], [1], [0, 0, 1, 1], [], []>} : vector<16x4xf32>, vector<4x64xf32>, vector<16x64xf32> -> vector<16x64xf32>
    %25 = arith.mulf %0, %24 : vector<16x64xf32>
    %c0_15 = arith.constant 0 : index
    %c0_16 = arith.constant 0 : index
    %26 = vector.load %arg6[%c0_15, %c0_16] : memref<64x16xf32, #tpu.memory_space<vmem>>, vector<64x16xf32>
    %cst_17 = arith.constant dense<0.000000e+00> : vector<16x16xf32>
    %27 = tpu.matmul %25, %26, %cst_17 {dimension_numbers = #tpu.dot_dimension_numbers<[1], [0], [0], [1], [0, 0, 1, 1], [], []>} : vector<16x64xf32>, vector<64x16xf32>, vector<16x16xf32> -> vector<16x16xf32>
    %c0_18 = arith.constant 0 : index
    %c0_19 = arith.constant 0 : index
    %28 = vector.load %arg7[%c0_18, %c0_19] : memref<16x16xf32, #tpu.memory_space<vmem>>, vector<16x16xf32>
    tpu.vector_store %arg7[%c0_18, %c0_19], %27 {strides = array<i32>} : memref<16x16xf32, #tpu.memory_space<vmem>>, vector<16x16xf32>,
    return
  }
  func.func @transform_0(%arg0: i32) -> (i32, i32) {
    %c0_i32 = arith.constant 0 : i32
    %c0_i32_0 = arith.constant 0 : i32
    return %arg0, %c0_i32 : i32, i32
  }
  func.func @transform_1(%arg0: i32) -> (i32, i32) {
    %c0_i32 = arith.constant 0 : i32
    %c0_i32_0 = arith.constant 0 : i32
    return %arg0, %c0_i32 : i32, i32
  }
  func.func @transform_2(%arg0: i32) -> (i32, i32) {
    %c0_i32 = arith.constant 0 : i32
    %c0_i32_0 = arith.constant 0 : i32
    %c0_i32_1 = arith.constant 0 : i32
    return %c0_i32, %c0_i32_0 : i32, i32
  }
  func.func @transform_3(%arg0: i32) -> (i32, i32) {
    %c0_i32 = arith.constant 0 : i32
    %c0_i32_0 = arith.constant 0 : i32
    %c0_i32_1 = arith.constant 0 : i32
    return %c0_i32, %c0_i32_0 : i32, i32
  }
  func.func @transform_4(%arg0: i32) -> (i32, i32) {
    %c0_i32 = arith.constant 0 : i32
    %c0_i32_0 = arith.constant 0 : i32
    %c0_i32_1 = arith.constant 0 : i32
    return %c0_i32, %c0_i32_0 : i32, i32
  }
  func.func @transform_5(%arg0: i32) -> (i32, i32) {
    %c0_i32 = arith.constant 0 : i32
    %c0_i32_0 = arith.constant 0 : i32
    %c0_i32_1 = arith.constant 0 : i32
    return %c0_i32, %c0_i32_0 : i32, i32
  }
  func.func @transform_6(%arg0: i32) -> (i32, i32) {
    %c0_i32 = arith.constant 0 : i32
    %c0_i32_0 = arith.constant 0 : i32
    return %arg0, %c0_i32 : i32, i32
  }
  func.func @transform_7(%arg0: i32) -> (i32, i32) {
    %c0_i32 = arith.constant 0 : i32
    %c0_i32_0 = arith.constant 0 : i32
    return %arg0, %c0_i32 : i32, i32
  }
}

</mosaic_0001>

<bundles_post_ra>
// kernel: mlp_self_attention.1
= control target key start
LH: loop header
LB: loop body
LE: loop exit
PB: predicated region body
PF: predicated region fallthrough
CT: control target
= control target key end

     0   :  { %vm43_vm0 = vcmask 523264   ;;  %v509_v5 = vmov 0   ;;  %s657_s0 = inlined_call_operand.vmem [shape: f32[16,64], index: 0, kind: input, shape index: {}]   ;;  %s658_s1 = inlined_call_operand.vmem [shape: s32[16,1], index: 1, kind: input, shape index: {}]   ;;  %s659_s2 = inlined_call_operand.vmem [shape: f32[64,4], index: 2, kind: input, shape index: {}]   ;;  %s660_s3 = inlined_call_operand.vmem [shape: f32[1,4], index: 3, kind: input, shape index: {}]   ;;  %s661_s4 = inlined_call_operand.vmem [shape: f32[4,64], index: 4, kind: input, shape index: {}]   ;;  %s662_s5 = inlined_call_operand.vmem [shape: f32[64,16], index: 5, kind: input, shape index: {}]   ;;  %s663_s6 = inlined_call_operand.hbm [shape: f32[16,16], index: 6, kind: output, shape index: {0}]   ;;  %s664_s7 = inlined_call_operand.vmem [shape: f32[16,4], index: 7, kind: output, shape index: {1}]  }
   0x1   :  { %v28_v0 = vld [vmem:[%s659_s2] sm:$0xff]  ;;  %v29_v1 = vld [vmem:[%s659_s2 + $0x8] sm:$0xff]  ;;  %v30_v2 = vld [vmem:[%s659_s2 + $0x10] sm:$0xff]  ;;  %476 = vset.pattern.permute.xlu0 %v509_v5 }
   0x2   :  { %v440_v3 = vpack.c.bf16 %v29_v1, %v28_v0  ;;  %v31_v4 = vld [vmem:[%s659_s2 + $0x18] sm:$0xff]  ;;  %v32_v7 = vld [vmem:[%s659_s2 + $0x20] sm:$0xff]  ;;  %v33_v8 = vld [vmem:[%s659_s2 + $0x28] sm:$0xff] }
   0x3   :  { %v444_v6 = vpack.c.bf16 %v31_v4, %v30_v2  ;;  %v574_v9 = vld [vmem:[%s657_s0] sm:$0xff]  ;;  %v126_v11 = vld [vmem:[%s658_s1 + $0x8] sm:$0xff] }
   0x4   :  { %441 = vmatprep.subr.bf16.mxu0 %v440_v3  ;;  %413 = vmatprep.mubr.msk.f32.mxu0 %vm43_vm0, %v574_v9  ;;  %v125_v10 = vld [vmem:[%s658_s1] sm:$0xff]  ;;  %vm128_vm2 = vcmp.ne.s32.totalorder %v126_v11, 0 }
   0x5   :  { %443 = vmatpush3.bf16.msra.mxu0 %v440_v3  ;;  %vm127_vm1 = vcmp.ne.s32.totalorder %v125_v10, 0 }
   0x6   :  { %13 = vsyncpa [#allocation3], 0  ;;  %445 = vmatprep.subr.bf16.mxu0 %v444_v6  ;;  %v448_v12 = vpack.c.bf16 %v33_v8, %v32_v7  ;;  %v129_v13 = vsel %vm127_vm1, 1, %v509_v5  ;;  %v34_v14 = vld [vmem:[%s659_s2 + $0x30] sm:$0xff]  ;;  %v35_v15 = vld [vmem:[%s659_s2 + $0x38] sm:$0xff]  ;;  %v130_v16 = vsel %vm128_vm2, 1, %v509_v5 }
   0x7   :  { %132 = vperm.xlu0 %476, %v129_v13   ;;  %v452_v17 = vpack.c.bf16 %v35_v15, %v34_v14  ;;  %v593_v18 = vld [vmem:[%s657_s0 + $0x8] sm:$0xff]  ;;  %v366_v21 = vld [vmem:[%s660_s3] ss:$0 sm:$0xff]  ;;  %vm141_vm5 = vcmask 31744   ;;  %vm173_vm6 = vcmask 1043456   ;;  %v256_v48 = vld [vmem:[%s662_s5 + $0x10] sm:$0xff] }
   0x8   :  { %v166_v40 = vld [vmem:[%s661_s4] sm:$0xf]  ;;  %v255_v42 = vld [vmem:[%s662_s5 + $0x8] sm:$0xff]  ;;  %v257_v49 = vld [vmem:[%s662_s5 + $0x18] sm:$0xff]  ;;  %s510_s20 = smov [#allocation2]   ;;  %vm343_vm7 = vcmask 130048  }
   0x9   :  { %447 = vmatpush3.bf16.msra.mxu0 %v444_v6  ;;  %416 = vmatprep.subr.msk.mxu1 %vm173_vm6, %v166_v40  ;;  %v254_v41 = vld [vmem:[%s662_s5] sm:$0xff]  ;;  %v460_v52 = vpack.c.bf16 %v257_v49, %v256_v48  ;;  %v259_v54 = vld [vmem:[%s662_s5 + $0x28] sm:$0xff]  ;;  %v260_v56 = vld [vmem:[%s662_s5 + $0x30] sm:$0xff]  ;;  %s351_s21 = sshll.u32 %s510_s20, 4  ;;  %s352_s21 = int_to_ptr.vmem [resolvable:$true] %s351_s21 }
   0xa   :  { %449 = vmatprep.subr.bf16.mxu0 %v448_v12  ;;  %417 = vmatpush3.msk.msra.mxu1 %vm173_vm6, %v166_v40  ;;  %v456_v43 = vpack.c.bf16 %v255_v42, %v254_v41  ;;  %v258_v53 = vld [vmem:[%s662_s5 + $0x20] sm:$0xff]  ;;  %v261_v57 = vld [vmem:[%s662_s5 + $0x38] sm:$0xff]  ;;  %s485_s5 = scalar_lea.vmem %s352_s21, 256  ;;  %p490_p1 = scmp.lt.s32.totalorder %s352_s21, %s352_s21 }
   0xb   :  { %135 = vperm.xlu0 %476, %v130_v16   ;;  %v464_v55 = vpack.c.bf16 %v259_v54, %v258_v53  ;;  %v468_v58 = vpack.c.bf16 %v261_v57, %v260_v56  ;;  %p486_p0 = scmp.ne.s32.totalorder %s352_s21, %s485_s5  ;;  %p491_p2 = scmp.lt.s32.totalorder %s485_s5, %s485_s5 }
   0xc   :  { %457 = vmatprep.subr.bf16.mxu1 %v456_v43 }
   0xd   :  { %451 = vmatpush3.bf16.msra.mxu0 %v448_v12  ;;  %p492_p3 = por %p491_p2, %p490_p1 }
   0xe   :  { %453 = vmatprep.subr.bf16.mxu0 %v452_v17 }
   0xf   :  { %p493_p4 = pnand %p492_p3, %p486_p0 }
  0x11   :  { %455 = vmatpush3.bf16.msra.mxu0 %v452_v17 }
  0x14   :  { %414 = vmatmul.mubr.msk.f32.vlgmr.msra.gmra.mrb[0].mxu0 %vm43_vm0, %v593_v18 }
  0x86   :  { %v133_v19 = vpop.permute.xlu0 %132 }
  0x87   :  { %vm137_vm4 = vcmp.eq.s32.totalorder %v133_v19, 1 }
  0x8a   :  { %v136_v20 = vpop.permute.xlu0 %135 }
  0x8b   :  { %vm138_vm3 = vcmp.eq.s32.totalorder %v136_v20, 1 }
  0xe7   :  { %v415_v22 = vpop.f32.mrb[0].mxu0 }
  0xe8   :  { %v122_v23 = vadd.f32 %v415_v22, %v366_v21  ;;  %v116_v24 = vpop.f32.mrb[1].mxu0 }
  0xe9   :  { %v117_v25 = vadd.f32 %v366_v21, %v116_v24 }
  0xea   :  { %v140_v26 = vsel %vm138_vm3, %v122_v23, -1e+09 }
  0xeb   :  { %143 = vst.msk [vmem:[%s664_s7 + $0x8] sm:$0xff] %vm141_vm5, %v140_v26  ;;  %v139_v27 = vsel %vm137_vm4, %v117_v25, -1e+09  ;;  %v147_v29 = vsel %vm141_vm5, %v140_v26, -inf }
  0xec   :  { %v144_v28 = vsel %vm141_vm5, %v139_v27, -inf  ;;  %142 = vst.msk [vmem:[%s664_s7] sm:$0xff] %vm141_vm5, %v139_v27 }
  0xed   :  { %145 = vmax.xlane.f32.xlu1 %v144_v28 }
  0xf1   :  { %148 = vmax.xlane.f32.xlu1 %v147_v29 }
 0x17a   :  { %v146_v30 = vpop.xlane.xlu1 %145 }
 0x17b   :  { %v150_v31 = vsub.f32 %v139_v27, %v146_v30 }
 0x17d   :  { %v152_v32 = vmul.f32 1.442695, %v150_v31 }
 0x17e   :  { %v149_v33 = vpop.xlane.xlu1 %148 }
 0x17f   :  { %477 = vpow2.f32 %v152_v32  ;;  %v151_v34 = vsub.f32 %v140_v26, %v149_v33 }
 0x181   :  { %v154_v35 = vmul.f32 1.442695, %v151_v34 }
 0x183   :  { %479 = vpow2.f32 %v154_v35 }
 0x189   :  { %v478_v36 = vpop.eup %477 }
 0x18a   :  { %v156_v37 = vsel %vm141_vm5, %v478_v36, 0.0 }
 0x18b   :  { %157 = vadd.xlane.f32.xlu0 %v156_v37 }
 0x18d   :  { %v480_v38 = vpop.eup %479 }
 0x18e   :  { %v159_v39 = vsel %vm141_vm5, %v480_v38, 0.0 }
 0x18f   :  { %160 = vadd.xlane.f32.xlu1 %v159_v39 }
 0x218   :  { %v158_v44 = vpop.xlane.xlu0 %157 }
 0x219   :  { %481 = vrcp.f32 %v158_v44 }
 0x21c   :  { %v161_v45 = vpop.xlane.xlu1 %160 }
 0x21d   :  { %483 = vrcp.f32 %v161_v45 }
 0x223   :  { %v482_v46 = vpop.eup %481 }
 0x224   :  { %v163_v47 = vmul.f32 %v482_v46, %v478_v36 }
 0x226   :  { %418 = vmatprep.mubr.msk.f32.mxu1 %vm141_vm5, %v163_v47 }
 0x227   :  { %v484_v50 = vpop.eup %483 }
 0x228   :  { %v165_v51 = vmul.f32 %v484_v50, %v480_v38 }
 0x22a   :  { %419 = vmatmul.mubr.msk.f32.vlgmr.msra.gmra.mrb[0].mxu1 %vm141_vm5, %v165_v51 }
 0x22b   :  { %459 = vmatpush3.bf16.msra.mxu1 %v456_v43 }
 0x22c   :  { %461 = vmatprep.subr.bf16.mxu1 %v460_v52 }
 0x22f   :  { %463 = vmatpush3.bf16.msra.mxu1 %v460_v52 }
 0x230   :  { %465 = vmatprep.subr.bf16.mxu1 %v464_v55 }
 0x233   :  { %467 = vmatpush3.bf16.msra.mxu1 %v464_v55 }
 0x234   :  { %469 = vmatprep.subr.bf16.mxu1 %v468_v58 }
 0x237   :  { %471 = vmatpush3.bf16.msra.mxu1 %v468_v58 }
 0x2fd   :  { %v420_v59 = vpop.f32.mrb[0].mxu1 }
 0x2fe   :  { %v243_v60 = vpop.f32.mrb[1].mxu1  ;;  %v253_v62 = vmul.f32 %v420_v59, %v593_v18 }
 0x2ff   :  { %v252_v61 = vmul.f32 %v243_v60, %v574_v9 }
 0x301   :  { %437 = vmatprep.mubr.msk.f32.mxu1 %vm43_vm0, %v252_v61 }
 0x302   :  { %438 = vmatmul.mubr.msk.f32.vlgmr.msra.gmra.mrb[2].mxu1 %vm43_vm0, %v253_v62 }
 0x3d5   :  { %v439_v63 = vpop.f32.mrb[2].mxu1 }
 0x3d6   :  { %345 = vst.msk [vmem:[#allocation2 + $0x8] sm:$0xff] %vm343_vm7, %v439_v63  ;;  %v334_v0 = vpop.f32.mrb[3].mxu1 }
 0x3d7   :  { %344 = vst.msk [vmem:[#allocation2] sm:$0xff] %vm343_vm7, %v334_v0 }
 0x3d8   :  { %496 = shalt.err (!%p493_p4)
}
 0x3d9   :  { %s497_s23 = scalar_lea.hbm %s663_s6, 256 }
 0x3da   :  { %p498_p5 = scmp.ne.s32.totalorder %s663_s6, %s497_s23  ;;  %p501_p6 = scmp.lt.u32.totalorder %s497_s23, %s663_s6 }
 0x3dc   :  { %p503_p7 = pnand %p501_p6, %p498_p5 }
 0x3de   :  { %506 = shalt.err (!%p503_p7)
}
 0x3df   :  { %s511_s26 = smov 128   ;;  %s512_s27 = smov 8  }
 0x3e0   :  { %357 = dma.vmem_to_hbm [thread:$0]  %s352_s21, 256, %s663_s6, [#allocation3], %s511_s26, %s511_s26, %s512_s27  }
 0x3e1   :  { %507 = dma.done.wait [#allocation3], 256  }
 0x3e2   :  { %508 = vsyncadd [#allocation3], 4294967040 }
 0x3e3   :  { %365 = vsyncpa [#allocation3], 1 }

</bundles_post_ra>
